<compile_context>
chip_gen: v7x
topology: tpu7x:2x2x1
jax: 0.10.0
libtpu: 0.0.40
codegen_flags: <defaults>
</compile_context>

<pallas_src>
from functools import partial

import jax
import jax.numpy as jnp
from jax.experimental import pallas as pl
from jax.experimental.pallas import tpu as pltpu


def _relu(v):
    return jnp.maximum(v, 0)


def _activation_fn(activation):
    if callable(activation):
        return activation
    if activation == "relu":
        return _relu
    if activation == "gelu":
        return partial(jax.nn.gelu, approximate=True)
    raise ValueError(f"unsupported activation: {activation!r}")


# ----------------------------------------------------------------------------- kernels
def _dropout_kernel_tpu(seed_ref, x_ref, o_ref, *, mode, thresh, scale, filterwise, act):
    """seed_ref: SMEM (1,) int32 (scalar prefetch); x_ref/o_ref: VMEM (rows, L) tiles."""
    y = act(x_ref[...])

    if mode == "passthrough":                 # p <= 0: activation only
        o_ref[...] = y.astype(o_ref.dtype)
        return
    if mode == "zero":                        # p >= 1: everything dropped (torch p=1)
        o_ref[...] = jnp.zeros_like(y).astype(o_ref.dtype)
        return

    # Independent stream per grid tile (otherwise every tile reuses the same mask).
    pltpu.prng_seed(seed_ref[0] + pl.program_id(0))

    rows, cols = x_ref.shape
    # dropout2d only needs one draw per (n, c) row: generate a single lane group.
    bits_shape = (rows, 128) if filterwise else (rows, cols)
    bits = pltpu.prng_random_bits(bits_shape)
    if bits.dtype != jnp.uint32:
        bits = pltpu.bitcast(bits, jnp.uint32)

    # Integer threshold compare on the top 23 bits — no float convert / multiply.
    r23 = pltpu.bitcast(bits >> 9, jnp.int32)           # uniform in [0, 2^23)
    keep = r23 >= thresh                                 # P(keep) = 1 - p
    if filterwise:
        keep = keep[:, 0:1]                              # per-row mask, lane-broadcast

    o_ref[...] = jnp.where(keep, y * scale, jnp.zeros_like(y)).astype(o_ref.dtype)


def _dropout_kernel_host(bits_ref, x_ref, o_ref, *, mode, thresh, scale, act):
    """Fallback body for non-TPU backends: bits_ref holds host-generated int32 in [0, 2^23)."""
    y = act(x_ref[...])
    if mode == "passthrough":
        o_ref[...] = y.astype(o_ref.dtype)
        return
    if mode == "zero":
        o_ref[...] = jnp.zeros_like(y).astype(o_ref.dtype)
        return
    keep = bits_ref[...] >= thresh                       # broadcasts (rows,1) for dropout2d
    o_ref[...] = jnp.where(keep, y * scale, jnp.zeros_like(y)).astype(o_ref.dtype)


# ----------------------------------------------------------------------------- layout
def _choose_layout(shape, filterwise):
    """Pick the 2-D (rows, lanes) slab the kernel operates on."""
    N, C, H, W = shape
    if filterwise:
        return N * C, H * W                  # rows must stay = channels for dropout2d
    total = N * C * H * W
    for lanes in (512, 1024, 2048, 4096, 256, 128):      # lane-dense, multiple of 128
        if total % lanes == 0:
            return total // lanes, lanes
    return N * C, H * W                      # fallback: may incur masked lane stores


def _choose_tile_rows(rows, lanes, itemsize):
    """Largest row tile that divides `rows` and keeps one block around ~1 MiB."""
    budget_rows = max(8, (1 << 20) // max(1, lanes * itemsize))
    for t in (1024, 512, 256, 128, 64, 32, 16, 8):
        if t <= budget_rows and t <= rows and rows % t == 0:
            return t
    return rows


# ----------------------------------------------------------------------------- wrapper
def activation_dropout(x, seed, *, dropout_probability, is_filterwise_dropout,
                       activation="relu"):
    """Pallas equivalent of ActivationDropout.forward (training=True).

    x: (N, C, H, W) float array.  Returns activation(x) with dropout (elementwise)
    or dropout2d (whole (n, c) channels) applied, survivors scaled by 1/(1-p).
    """
    N, C, H, W = x.shape
    act = _activation_fn(activation)
    p = float(dropout_probability)

    if p <= 0.0:
        mode = "passthrough"
    elif p >= 1.0:
        mode = "zero"
    else:
        mode = "dropout"
    thresh = int(round(min(max(p, 0.0), 1.0) * (1 << 23)))
    scale = 1.0 / (1.0 - p) if mode == "dropout" else 1.0

    filterwise = bool(is_filterwise_dropout)
    rows, lanes = _choose_layout(x.shape, filterwise)
    x2 = x.reshape(rows, lanes)
    tile_rows = _choose_tile_rows(rows, lanes, x.dtype.itemsize)
    grid = (rows // tile_rows,)

    if jax.default_backend() == "tpu":
        kernel = partial(_dropout_kernel_tpu, mode=mode, thresh=thresh, scale=scale,
                         filterwise=filterwise, act=act)
        seed_arr = jnp.asarray([seed], dtype=jnp.int32)
        grid_spec = pltpu.PrefetchScalarGridSpec(
            num_scalar_prefetch=1,
            grid=grid,
            in_specs=[pl.BlockSpec((tile_rows, lanes), lambda i, seed_ref: (i, 0))],
            out_specs=pl.BlockSpec((tile_rows, lanes), lambda i, seed_ref: (i, 0)),
        )
        out2 = pl.pallas_call(
            kernel,
            out_shape=jax.ShapeDtypeStruct((rows, lanes), x.dtype),
            grid_spec=grid_spec,
            compiler_params=pltpu.CompilerParams(
                dimension_semantics=("parallel",),
                vmem_limit_bytes=32 * 1024 * 1024,
            ),
        )(seed_arr, x2)
    else:
        # Non-TPU fallback (e.g. CPU interpret): TPU PRNG primitives have no CPU
        # lowering, so pass host-generated random bits with identical semantics.
        kernel = partial(_dropout_kernel_host, mode=mode, thresh=thresh, scale=scale,
                         act=act)
        bits_lanes = 1 if (filterwise or mode != "dropout") else lanes
        bits = jax.random.randint(jax.random.PRNGKey(int(seed)),
                                  (rows, bits_lanes), 0, 1 << 23, dtype=jnp.int32)
        out2 = pl.pallas_call(
            kernel,
            out_shape=jax.ShapeDtypeStruct((rows, lanes), x.dtype),
            grid=grid,
            in_specs=[pl.BlockSpec((tile_rows, bits_lanes), lambda i: (i, 0)),
                      pl.BlockSpec((tile_rows, lanes), lambda i: (i, 0))],
            out_specs=pl.BlockSpec((tile_rows, lanes), lambda i: (i, 0)),
        )(bits, x2)

    return out2.reshape(N, C, H, W)


# TODO(synk): DropoutWrapper's module-regex replacement, MC-sample averaging loop and
# checkpoint loading are PyTorch module plumbing (no kernel work); only the injected
# ActivationDropout forward is implemented here.


if __name__ == "__main__":
    key = jax.random.PRNGKey(0)
    x = jax.random.normal(key, (2, 4, 16, 16), dtype=jnp.float32)
    p = 0.3
    scale = 1.0 / (1.0 - p)
    relu_x = jnp.maximum(x, 0.0)

    # Elementwise dropout (F.dropout path): each output is 0 or scaled ReLU(x).
    y_elem = jax.block_until_ready(activation_dropout(
        x, seed=123, dropout_probability=p, is_filterwise_dropout=False))
    ok_elem = bool(jnp.all(
        (jnp.abs(y_elem) < 1e-6) | (jnp.abs(y_elem - relu_x * scale) < 1e-4)))
    assert ok_elem, "elementwise dropout semantics mismatch"

    # Filterwise dropout (F.dropout2d path): whole (n, c) channels kept or dropped.
    y_filt = jax.block_until_ready(activation_dropout(
        x, seed=456, dropout_probability=p, is_filterwise_dropout=True))
    chan_zero = jnp.all(jnp.abs(y_filt) < 1e-6, axis=(2, 3))
    chan_kept = jnp.all(jnp.abs(y_filt - relu_x * scale) < 1e-4, axis=(2, 3))
    assert bool(jnp.all(chan_zero | chan_kept)), "filterwise dropout semantics mismatch"

    # p = 0 (activation only) and p = 1 (all dropped) edge cases.
    y_p0 = jax.block_until_ready(activation_dropout(
        x, seed=1, dropout_probability=0.0, is_filterwise_dropout=False))
    assert bool(jnp.allclose(y_p0, relu_x, atol=1e-6)), "p=0 passthrough mismatch"
    y_p1 = jax.block_until_ready(activation_dropout(
        x, seed=1, dropout_probability=1.0, is_filterwise_dropout=True))
    assert bool(jnp.all(y_p1 == 0)), "p=1 should zero everything"

    # GELU variant (DropoutWrapper also replaces GELU modules).
    y_gelu = jax.block_until_ready(activation_dropout(
        x, seed=7, dropout_probability=p, is_filterwise_dropout=False, activation="gelu"))
    assert y_gelu.shape == x.shape and bool(jnp.all(jnp.isfinite(y_gelu)))

    assert y_elem.shape == x.shape and y_filt.shape == x.shape
    print("KERNEL_OK")
</pallas_src>

<mosaic_0001>
module attributes {stable_mosaic.version = 11 : i64} {
  func.func @_dropout_kernel_host(%arg0: i32, %arg1: memref<4x512xi32, #tpu.memory_space<vmem>>, %arg2: memref<4x512xf32, #tpu.memory_space<vmem>>, %arg3: memref<4x512xf32, #tpu.memory_space<vmem>>) attributes {dimension_semantics = [#tpu.dimension_semantics<arbitrary>], iteration_bounds = array<i64: 1>, scalar_prefetch = 0 : i64, scratch_operands = 0 : i64, tpu.core_type = #tpu.core_type<tc>, window_params = [{transform_indices = @transform_0, window_bounds = array<i64: 4, 512>}, {transform_indices = @transform_1, window_bounds = array<i64: 4, 512>}, {transform_indices = @transform_2, window_bounds = array<i64: 4, 512>}]} {
    %c0 = arith.constant 0 : index
    %c0_0 = arith.constant 0 : index
    %0 = vector.load %arg2[%c0, %c0_0] : memref<4x512xf32, #tpu.memory_space<vmem>>, vector<4x512xf32>
    %cst = arith.constant 0.000000e+00 : f32
    %1 = vector.broadcast %cst : f32 to vector<4x512xf32>
    %2 = arith.maximumf %0, %1 : vector<4x512xf32>
    %c0_1 = arith.constant 0 : index
    %c0_2 = arith.constant 0 : index
    %3 = vector.load %arg1[%c0_1, %c0_2] : memref<4x512xi32, #tpu.memory_space<vmem>>, vector<4x512xi32>
    %c2516582_i32 = arith.constant 2516582 : i32
    %4 = vector.broadcast %c2516582_i32 : i32 to vector<4x512xi32>
    %5 = arith.cmpi sge, %3, %4 : vector<4x512xi32>
    %cst_3 = arith.constant 1.42857146 : f32
    %6 = vector.broadcast %cst_3 : f32 to vector<4x512xf32>
    %7 = arith.mulf %2, %6 : vector<4x512xf32>
    %cst_4 = arith.constant 0.000000e+00 : f32
    %8 = vector.broadcast %cst_4 : f32 to vector<4x512xf32>
    %9 = arith.select %5, %7, %8 : vector<4x512xi1>, vector<4x512xf32>
    %c0_5 = arith.constant 0 : index
    %c0_6 = arith.constant 0 : index
    %10 = vector.load %arg3[%c0_5, %c0_6] : memref<4x512xf32, #tpu.memory_space<vmem>>, vector<4x512xf32>
    tpu.vector_store %arg3[%c0_5, %c0_6], %9 {strides = array<i32>} : memref<4x512xf32, #tpu.memory_space<vmem>>, vector<4x512xf32>,
    return
  }
  func.func @transform_0(%arg0: i32) -> (i32, i32) {
    %c0_i32 = arith.constant 0 : i32
    %c0_i32_0 = arith.constant 0 : i32
    return %arg0, %c0_i32 : i32, i32
  }
  func.func @transform_1(%arg0: i32) -> (i32, i32) {
    %c0_i32 = arith.constant 0 : i32
    %c0_i32_0 = arith.constant 0 : i32
    return %arg0, %c0_i32 : i32, i32
  }
  func.func @transform_2(%arg0: i32) -> (i32, i32) {
    %c0_i32 = arith.constant 0 : i32
    %c0_i32_0 = arith.constant 0 : i32
    return %arg0, %c0_i32 : i32, i32
  }
}

</mosaic_0001>

<bundles_post_ra>
// kernel: tpu_custom_call.1
= control target key start
LH: loop header
LB: loop body
LE: loop exit
PB: predicated region body
PF: predicated region fallthrough
CT: control target
= control target key end

     0   :  { %7 = vsyncpa [#allocation3], 0  ;;  %s195_s0 = inlined_call_operand.hbm [shape: s32[4,512], index: 0, kind: input, shape index: {}]   ;;  %s196_s1 = inlined_call_operand.hbm [shape: f32[4,512], index: 1, kind: input, shape index: {}]   ;;  %s197_s2 = inlined_call_operand.hbm [shape: f32[4,512], index: 2, kind: output, shape index: {}]  }
   0x1   :  { %8 = vsyncpa [#allocation6], 0 }
   0x2   :  { %9 = vsyncpa [#allocation4], 0  ;;  %s141_s9 = smov [#allocation2]   ;;  %s142_s11 = smov [#allocation5]  }
   0x3   :  { %s16_s10 = sshll.u32 %s141_s9, 4  ;;  %s26_s12 = sshll.u32 %s142_s11, 4  ;;  %s17_s10 = int_to_ptr.vmem [resolvable:$true] %s16_s10  ;;  %s27_s12 = int_to_ptr.vmem [resolvable:$true] %s26_s12 }
   0x4   :  { %s69_s15 = scalar_lea.hbm %s195_s0, 256 }
   0x5   :  { %p70_p0 = scmp.ne.s32.totalorder %s195_s0, %s69_s15  ;;  %p73_p1 = scmp.lt.u32.totalorder %s69_s15, %s195_s0 }
   0x7   :  { %p75_p2 = pnand %p73_p1, %p70_p0 }
   0x9   :  { %78 = shalt.err (!%p75_p2)
}
   0xa   :  { %s79_s20 = scalar_lea.vmem %s17_s10, 256  ;;  %p84_p4 = scmp.lt.s32.totalorder %s17_s10, %s17_s10 }
   0xb   :  { %p80_p3 = scmp.ne.s32.totalorder %s17_s10, %s79_s20  ;;  %p85_p5 = scmp.lt.s32.totalorder %s79_s20, %s79_s20 }
   0xd   :  { %p86_p6 = por %p85_p5, %p84_p4 }
   0xf   :  { %p87_p7 = pnand %p86_p6, %p80_p3 }
  0x11   :  { %90 = shalt.err (!%p87_p7)
}
  0x12   :  { %19 = dma.hbm_to_vmem [thread:$0]  %s195_s0, 256, %s17_s10, [#allocation3]  }
  0x13   :  { %s91_s25 = scalar_lea.hbm %s196_s1, 256 }
  0x14   :  { %p92_p8 = scmp.ne.s32.totalorder %s196_s1, %s91_s25  ;;  %p95_p9 = scmp.lt.u32.totalorder %s91_s25, %s196_s1 }
  0x16   :  { %p97_p10 = pnand %p95_p9, %p92_p8 }
  0x18   :  { %100 = shalt.err (!%p97_p10)
}
  0x19   :  { %s101_s30 = scalar_lea.vmem %s27_s12, 256  ;;  %p106_p12 = scmp.lt.s32.totalorder %s27_s12, %s27_s12 }
  0x1a   :  { %p102_p11 = scmp.ne.s32.totalorder %s27_s12, %s101_s30  ;;  %p107_p13 = scmp.lt.s32.totalorder %s101_s30, %s101_s30 }
  0x1c   :  { %p108_p0 = por %p107_p13, %p106_p12 }
  0x1e   :  { %p109_p1 = pnand %p108_p0, %p102_p11 }
  0x20   :  { %112 = shalt.err (!%p109_p1)
}
  0x21   :  { %29 = dma.hbm_to_vmem [thread:$0]  %s196_s1, 256, %s27_s12, [#allocation6]  }
  0x22   :  { %135 = dma.done.wait [#allocation3], 256  }
  0x23   :  { %136 = vsyncadd [#allocation3], 4294967040 }
  0x24   :  { %137 = dma.done.wait [#allocation6], 256  }
  0x25   :  { %138 = vsyncadd [#allocation6], 4294967040  ;;  %v36_v0 = vld [vmem:[#allocation5] sm:$0xff]  ;;  %v40_v1 = vld [vmem:[#allocation2] sm:$0xff]  ;;  %s143_s4 = smov [#allocation7]  }
  0x26   :  { %v37_v2 = vld [vmem:[#allocation5 + $0x8] sm:$0xff]  ;;  %v38_v3 = vmax.f32 %v36_v0, 0.0  ;;  %v41_v5 = vld [vmem:[#allocation2 + $0x8] sm:$0xff]  ;;  %s56_s5 = sshll.u32 %s143_s4, 4  ;;  %vm42_vm0 = vcmp.ge.s32.totalorder %v40_v1, 2516582  ;;  %s57_s5 = int_to_ptr.vmem [resolvable:$true] %s56_s5 }
  0x27   :  { %v39_v4 = vmax.f32 %v37_v2, 0.0  ;;  %vm43_vm1 = vcmp.ge.s32.totalorder %v41_v5, 2516582  ;;  %s113_s1 = scalar_lea.vmem %s57_s5, 256  ;;  %p118_p3 = scmp.lt.s32.totalorder %s57_s5, %s57_s5 }
  0x28   :  { %v44_v6 = vmul.f32 1.4285715, %v38_v3  ;;  %p114_p2 = scmp.ne.s32.totalorder %s57_s5, %s113_s1  ;;  %p119_p4 = scmp.lt.s32.totalorder %s113_s1, %s113_s1 }
  0x29   :  { %v45_v7 = vmul.f32 1.4285715, %v39_v4 }
  0x2a   :  { %v46_v8 = vsel %vm42_vm0, %v44_v6, 0.0  ;;  %p120_p5 = por %p119_p4, %p118_p3 }
  0x2b   :  { %v47_v9 = vsel %vm43_vm1, %v45_v7, 0.0  ;;  %48 = vst [vmem:[#allocation7] sm:$0xff] %v46_v8 }
  0x2c   :  { %49 = vst [vmem:[#allocation7 + $0x8] sm:$0xff] %v47_v9  ;;  %p121_p6 = pnand %p120_p5, %p114_p2 }
  0x2e   :  { %124 = shalt.err (!%p121_p6)
}
  0x2f   :  { %s125_s8 = scalar_lea.hbm %s197_s2, 256 }
  0x30   :  { %p126_p7 = scmp.ne.s32.totalorder %s197_s2, %s125_s8  ;;  %p129_p8 = scmp.lt.u32.totalorder %s125_s8, %s197_s2 }
  0x32   :  { %p131_p9 = pnand %p129_p8, %p126_p7 }
  0x34   :  { %134 = shalt.err (!%p131_p9)
}
  0x35   :  { %59 = dma.vmem_to_hbm [thread:$0]  %s57_s5, 256, %s197_s2, [#allocation4]  }
  0x36   :  { %139 = dma.done.wait [#allocation4], 256  }
  0x37   :  { %140 = vsyncadd [#allocation4], 4294967040 }
  0x38   :  { %63 = vsyncpa [#allocation3], 1 }
  0x39   :  { %64 = vsyncpa [#allocation6], 1 }
  0x3a   :  { %65 = vsyncpa [#allocation4], 1 }

</bundles_post_ra>
